<compile_context>
chip_gen: v5e
topology: v5e:2x2
jax: 0.10.0
libtpu: 0.0.40
codegen_flags: <defaults>
</compile_context>

<pallas_src>
import functools

import jax
import jax.numpy as jnp
from jax.experimental import pallas as pl
from jax.experimental.pallas import tpu as pltpu

WEIGHT_MSE = 1.0
WEIGHT_NLL = 10.0


def _atac_loss_kernel(tc_ref, lg_ref, tp_ref, sk_ref, mnlll_ref, mse_ref, *,
                      block_b, tp_sk_resident):
    i = pl.program_id(1)

    @pl.when(i == 0)
    def _init():
        mnlll_ref[...] = jnp.zeros_like(mnlll_ref)
        mse_ref[...] = jnp.zeros_like(mse_ref)

    tc = tc_ref[...].astype(jnp.float32)      # (TB, Lp)
    lg = lg_ref[...].astype(jnp.float32)      # (TB, Lp)

    if tp_sk_resident:
        # tp/sk live fully in VMEM (constant index_map); slice this tile's rows.
        c = pl.program_id(0)
        row0 = pl.multiple_of((c * pl.num_programs(1) + i) * block_b, block_b)
        tp = tp_ref[pl.ds(row0, block_b), :]  # (TB, 1) f32
        sk = sk_ref[pl.ds(row0, block_b), :]  # (TB, 1) f32
    else:
        tp = tp_ref[...]                      # (TB, 1) f32
        sk = sk_ref[...]                      # (TB, 1) f32

    # counts_per_example = true_counts.sum(dim=1)
    counts = jnp.sum(tc, axis=-1, keepdims=True)                  # (TB, 1)

    # guarded per-row reciprocal: rows with counts == 0 contribute ce == 0,
    # reproducing the reference's NaN -> 0 behavior on the soft targets.
    nonzero = counts > 0.0
    safe_counts = jnp.where(nonzero, counts, 1.0)
    inv_counts = jnp.where(nonzero, pl.reciprocal(safe_counts, approx=False), 0.0)
    sum_prob = counts * inv_counts                                 # 1.0 or 0.0

    # fused soft-target cross entropy:
    #   ce = -sum_l prob*log_softmax = sum(prob)*lse - sum(tc*shifted)/counts
    m = jnp.max(lg, axis=-1, keepdims=True)                        # (TB, 1)
    shifted = lg - m                                               # (TB, Lp)
    lse = jnp.log(jnp.sum(jnp.exp(shifted), axis=-1, keepdims=True))
    weighted = jnp.sum(tc * shifted, axis=-1, keepdims=True)       # (TB, 1)
    ce = sum_prob * lse - inv_counts * weighted                    # (TB, 1)

    mnlll_per = ce * WEIGHT_NLL                                    # (TB, 1)
    mse_per = (jnp.log(counts + 1.0) - tp) ** 2                    # (TB, 1)

    # masked partial sums over this batch tile, accumulated into the per-core
    # resident output blocks (written back to HBM once at grid end).
    mnlll_part = jnp.sum(mnlll_per * sk, axis=0, keepdims=True)    # (1, 1)
    mse_part = jnp.sum(mse_per * sk, axis=0, keepdims=True)        # (1, 1)
    mnlll_ref[...] += mnlll_part.reshape(1, 1, 1)
    mse_ref[...] += mse_part.reshape(1, 1, 1)


def _round_up(x, m):
    return ((x + m - 1) // m) * m


def atac_loss_mnlll(true_counts, logits, tot_pred, idx_skip, *,
                    block_b=None, num_cores=None):
    """Pallas wrapper reproducing ATACloss_MNLLL.forward.

    true_counts: (B, L)   logits: (B, L)
    tot_pred:    (B,) or (B, 1)   idx_skip: (B,)
    returns (loss, MNLLL, MSE) as float32 scalars.
    """
    B, L = true_counts.shape
    tc, lg = true_counts, logits
    tp = jnp.reshape(tot_pred, (B, 1)).astype(jnp.float32)   # == .squeeze() semantics
    sk = jnp.reshape(idx_skip, (B, 1)).astype(jnp.float32)

    itemsize = max(jnp.dtype(tc.dtype).itemsize, jnp.dtype(lg.dtype).itemsize)
    L_pad = _round_up(L, 128)

    # --- chip detection (v7x: 64 MiB VMEM per TC, 2 TCs per chip) -----------
    kind = ""
    try:
        kind = jax.devices()[0].device_kind.lower()
    except Exception:
        pass
    is_v7 = "v7" in kind

    try:
        vmem_physical = int(pltpu.get_tpu_info().vmem_capacity_bytes)
    except Exception:
        vmem_physical = 64 * 1024 * 1024          # conservative (v7x-safe) fallback
    if is_v7:
        vmem_physical = min(vmem_physical, 64 * 1024 * 1024)
    vmem_limit = min((vmem_physical * 3) // 4, 96 * 1024 * 1024)

    num_tc = int(num_cores) if num_cores is not None else (2 if is_v7 else 1)
    num_tc = max(1, num_tc)

    # --- batch tile size -----------------------------------------------------
    # sublane multiple, dtype-aware (f32: 8, bf16: 16, int8/fp8: 32)
    mult = 8 if itemsize >= 4 else (16 if itemsize == 2 else 32)

    if block_b is None:
        # two double-buffered native-dtype (TB, Lp) streams + ~4 f32 (TB, Lp)
        # in-kernel temporaries (f32 casts, shifted, exp, tc*shifted).
        bytes_per_row = 2 * 2 * L_pad * itemsize + 4 * L_pad * 4
        budget = (vmem_limit * 2) // 3
        block_b = budget // max(bytes_per_row, 1)
        cap = 1024 if vmem_physical <= 64 * 1024 * 1024 else 2048
        block_b = min(block_b, cap)
    block_b = max(mult, (int(block_b) // mult) * mult)

    rows_per_core = -(-B // num_tc)
    block_b = max(mult, min(block_b, _round_up(rows_per_core, mult)))

    per_super = block_b * num_tc
    n_tiles = -(-B // per_super)
    b_pad = n_tiles * per_super

    # --- padding --------------------------------------------------------------
    if b_pad != B:
        pad = b_pad - B
        # padded rows have counts == 0 and sk == 0 -> contribute exactly 0.
        tc = jnp.pad(tc, ((0, pad), (0, 0)))
        lg = jnp.pad(lg, ((0, pad), (0, 0)))
        tp = jnp.pad(tp, ((0, pad), (0, 0)))
        sk = jnp.pad(sk, ((0, pad), (0, 0)))
    if L_pad != L:
        # counts padded with 0; logits with a large *finite* negative value so
        # padded lanes never win the max, contribute exp()=0, and 0*shifted=0.
        if jnp.issubdtype(jnp.dtype(lg.dtype), jnp.floating):
            neg = max(-1e30, float(jnp.finfo(jnp.dtype(lg.dtype)).min) * 0.5)
        else:
            neg = -1e30
        tc = jnp.pad(tc, ((0, 0), (0, L_pad - L)))
        lg = jnp.pad(lg, ((0, 0), (0, L_pad - L)), constant_values=neg)

    # make tp/sk VMEM-resident when their (double-buffered) footprint is tiny
    tp_sk_resident = (2 * 2 * ((b_pad + 7) // 8) * 4096) <= (4 * 1024 * 1024)

    # --- pallas_call ----------------------------------------------------------
    tile_map = lambda c, i: (c * n_tiles + i, 0)
    in_specs = [
        pl.BlockSpec((block_b, L_pad), tile_map),
        pl.BlockSpec((block_b, L_pad), tile_map),
    ]
    if tp_sk_resident:
        aux_spec = pl.BlockSpec((b_pad, 1), lambda c, i: (0, 0))
    else:
        aux_spec = pl.BlockSpec((block_b, 1), tile_map)
    in_specs += [aux_spec, aux_spec]

    out_spec = pl.BlockSpec((1, 1, 1), lambda c, i: (c, 0, 0))
    out_shape = jax.ShapeDtypeStruct((num_tc, 1, 1), jnp.float32)

    kernel = functools.partial(_atac_loss_kernel, block_b=block_b,
                               tp_sk_resident=tp_sk_resident)

    mnlll_parts, mse_parts = pl.pallas_call(
        kernel,
        out_shape=(out_shape, out_shape),
        grid_spec=pltpu.PrefetchScalarGridSpec(
            num_scalar_prefetch=0,
            grid=(num_tc, n_tiles),
            in_specs=in_specs,
            out_specs=(out_spec, out_spec),
        ),
        compiler_params=pltpu.CompilerParams(
            dimension_semantics=("parallel", "arbitrary"),
            vmem_limit_bytes=int(vmem_limit),
        ),
    )(tc, lg, tp, sk)

    mnlll = jnp.sum(mnlll_parts)
    mse = jnp.sum(mse_parts)
    # loss = weight_MSE * MSE + weight_NLL * MNLLL
    # (weight_NLL is applied a second time here, exactly as in PyTorch)
    loss = WEIGHT_MSE * mse + WEIGHT_NLL * mnlll
    return loss, mnlll, mse


def _reference(true_counts, logits, tot_pred, idx_skip):
    """Pure-JAX reference matching the PyTorch forward exactly."""
    tcf = true_counts.astype(jnp.float32)
    lgf = logits.astype(jnp.float32)
    tpf = jnp.squeeze(tot_pred.astype(jnp.float32))
    skf = idx_skip.astype(jnp.float32)

    counts = jnp.sum(tcf, axis=1)
    prob = tcf / counts[:, None]
    prob = jnp.where(jnp.isnan(prob), 0.0, prob)
    logsm = jax.nn.log_softmax(lgf, axis=1)
    ce = -jnp.sum(prob * logsm, axis=1)
    mnlll_per = ce * WEIGHT_NLL
    mse_per = (jnp.log(counts + 1.0) - tpf) ** 2
    mnlll = jnp.sum(mnlll_per * skf, axis=0)
    mse = jnp.sum(mse_per * skf, axis=0)
    loss = jnp.sum(WEIGHT_MSE * mse + WEIGHT_NLL * mnlll)
    return loss, mnlll, mse


if __name__ == "__main__":
    def make_inputs(key, B, L):
        k1, k2, k3, k4 = jax.random.split(key, 4)
        # synthetic ATAC-style inputs: nonnegative counts, real-valued logits
        true_counts = jnp.floor(
            10.0 * jax.random.uniform(k1, (B, L), dtype=jnp.float32))
        # make one example all-zero to exercise the NaN -> 0 path
        true_counts = true_counts.at[min(3, B - 1)].set(0.0)
        logits = jax.random.normal(k2, (B, L), dtype=jnp.float32)
        tot_pred = jax.random.normal(k3, (B, 1), dtype=jnp.float32) + 6.0
        idx_skip = (jax.random.uniform(k4, (B,)) > 0.25).astype(jnp.float32)
        return true_counts, logits, tot_pred, idx_skip

    # Case 1: aligned shapes (B=8, L=128), default tiling
    inputs = make_inputs(jax.random.PRNGKey(0), 8, 128)
    out = atac_loss_mnlll(*inputs)
    jax.block_until_ready(out)
    ref = _reference(*inputs)
    for a, b in zip(out, ref):
        assert jnp.allclose(a, b, rtol=1e-4, atol=1e-2), (a, b)

    # Case 2: batch padding (B=20 -> 24) + L padding (L=200 -> 256), multi-tile
    inputs2 = make_inputs(jax.random.PRNGKey(1), 20, 200)
    out2 = atac_loss_mnlll(*inputs2, block_b=8)
    jax.block_until_ready(out2)
    ref2 = _reference(*inputs2)
    for a, b in zip(out2, ref2):
        assert jnp.allclose(a, b, rtol=1e-4, atol=1e-2), (a, b)

    print("KERNEL_OK")
</pallas_src>

<mosaic_0001>
module attributes {stable_mosaic.version = 11 : i64} {
  func.func @_atac_loss_kernel(%arg0: i32, %arg1: i32, %arg2: memref<8x128xf32, #tpu.memory_space<vmem>>, %arg3: memref<8x128xf32, #tpu.memory_space<vmem>>, %arg4: memref<8x1xf32, #tpu.memory_space<vmem>>, %arg5: memref<8x1xf32, #tpu.memory_space<vmem>>, %arg6: memref<1x1x1xf32, #tpu.memory_space<vmem>>, %arg7: memref<1x1x1xf32, #tpu.memory_space<vmem>>) attributes {dimension_semantics = [#tpu.dimension_semantics<parallel>, #tpu.dimension_semantics<arbitrary>], iteration_bounds = array<i64: 1, 1>, scalar_prefetch = 0 : i64, scratch_operands = 0 : i64, tpu.core_type = #tpu.core_type<tc>, window_params = [{transform_indices = @transform_0, window_bounds = array<i64: 8, 128>}, {transform_indices = @transform_1, window_bounds = array<i64: 8, 128>}, {pipeline_mode = #tpu.pipeline_mode<synchronous>, transform_indices = @transform_2, window_bounds = array<i64: 8, 1>}, {pipeline_mode = #tpu.pipeline_mode<synchronous>, transform_indices = @transform_3, window_bounds = array<i64: 8, 1>}, {transform_indices = @transform_4, window_bounds = array<i64: 1, 1, 1>}, {transform_indices = @transform_5, window_bounds = array<i64: 1, 1, 1>}]} {
    %c0_i32 = arith.constant 0 : i32
    %0 = arith.cmpi eq, %arg1, %c0_i32 : i32
    %1 = arith.extui %0 : i1 to i32
    %c0_i32_0 = arith.constant 0 : i32
    %2 = arith.cmpi ne, %1, %c0_i32_0 : i32
    scf.if %2 {
      %cst_28 = arith.constant 0.000000e+00 : f32
      %58 = vector.broadcast %cst_28 : f32 to vector<1x1x1xf32>
      %c0_29 = arith.constant 0 : index
      %c0_30 = arith.constant 0 : index
      %c0_31 = arith.constant 0 : index
      %59 = vector.load %arg6[%c0_29, %c0_30, %c0_31] : memref<1x1x1xf32, #tpu.memory_space<vmem>>, vector<1x1x1xf32>
      tpu.vector_store %arg6[%c0_29, %c0_30, %c0_31], %58 {strides = array<i32>} : memref<1x1x1xf32, #tpu.memory_space<vmem>>, vector<1x1x1xf32>,
      %cst_32 = arith.constant 0.000000e+00 : f32
      %60 = vector.broadcast %cst_32 : f32 to vector<1x1x1xf32>
      %c0_33 = arith.constant 0 : index
      %c0_34 = arith.constant 0 : index
      %c0_35 = arith.constant 0 : index
      %61 = vector.load %arg7[%c0_33, %c0_34, %c0_35] : memref<1x1x1xf32, #tpu.memory_space<vmem>>, vector<1x1x1xf32>
      tpu.vector_store %arg7[%c0_33, %c0_34, %c0_35], %60 {strides = array<i32>} : memref<1x1x1xf32, #tpu.memory_space<vmem>>, vector<1x1x1xf32>,
    } else {
    }
    %c0 = arith.constant 0 : index
    %c0_1 = arith.constant 0 : index
    %3 = vector.load %arg2[%c0, %c0_1] : memref<8x128xf32, #tpu.memory_space<vmem>>, vector<8x128xf32>
    %c0_2 = arith.constant 0 : index
    %c0_3 = arith.constant 0 : index
    %4 = vector.load %arg3[%c0_2, %c0_3] : memref<8x128xf32, #tpu.memory_space<vmem>>, vector<8x128xf32>
    %c1_i32 = arith.constant 1 : i32
    %5 = arith.muli %arg0, %c1_i32 : i32
    %6 = arith.addi %5, %arg1 : i32
    %c8_i32 = arith.constant 8 : i32
    %7 = arith.muli %6, %c8_i32 : i32
    %8 = tpu.assume_multiple %7, 8 : i32
    %9 = arith.index_cast %8 : i32 to index
    %c0_4 = arith.constant 0 : index
    %10 = vector.load %arg4[%9, %c0_4] : memref<8x1xf32, #tpu.memory_space<vmem>>, vector<8x1xf32>
    %11 = arith.index_cast %8 : i32 to index
    %c0_5 = arith.constant 0 : index
    %12 = vector.load %arg5[%11, %c0_5] : memref<8x1xf32, #tpu.memory_space<vmem>>, vector<8x1xf32>
    %cst = arith.constant dense<0.000000e+00> : vector<8xf32>
    %13 = vector.multi_reduction <add>, %3, %cst [1] : vector<8x128xf32> to vector<8xf32>
    %14 = vector.shape_cast %13 : vector<8xf32> to vector<8x1xf32>
    %cst_6 = arith.constant 0.000000e+00 : f32
    %15 = vector.broadcast %cst_6 : f32 to vector<8x1xf32>
    %16 = arith.cmpf ogt, %14, %15 : vector<8x1xf32>
    %cst_7 = arith.constant 1.000000e+00 : f32
    %17 = vector.broadcast %cst_7 : f32 to vector<8x1xf32>
    %18 = arith.select %16, %14, %17 : vector<8x1xi1>, vector<8x1xf32>
    %19 = tpu.reciprocal %18 : vector<8x1xf32> -> vector<8x1xf32>
    %cst_8 = arith.constant 0.000000e+00 : f32
    %20 = vector.broadcast %cst_8 : f32 to vector<8x1xf32>
    %21 = arith.select %16, %19, %20 : vector<8x1xi1>, vector<8x1xf32>
    %22 = arith.mulf %14, %21 : vector<8x1xf32>
    %cst_9 = arith.constant dense<0xFF800000> : vector<8xf32>
    %23 = vector.multi_reduction <maximumf>, %4, %cst_9 [1] : vector<8x128xf32> to vector<8xf32>
    %24 = vector.shape_cast %23 : vector<8xf32> to vector<8x1xf32>
    %25 = vector.broadcast %24 : vector<8x1xf32> to vector<8x128xf32>
    %26 = arith.subf %4, %25 : vector<8x128xf32>
    %27 = math.exp %26 : vector<8x128xf32>
    %cst_10 = arith.constant dense<0.000000e+00> : vector<8xf32>
    %28 = vector.multi_reduction <add>, %27, %cst_10 [1] : vector<8x128xf32> to vector<8xf32>
    %29 = vector.shape_cast %28 : vector<8xf32> to vector<8x1xf32>
    %30 = math.log %29 : vector<8x1xf32>
    %31 = arith.mulf %3, %26 : vector<8x128xf32>
    %cst_11 = arith.constant dense<0.000000e+00> : vector<8xf32>
    %32 = vector.multi_reduction <add>, %31, %cst_11 [1] : vector<8x128xf32> to vector<8xf32>
    %33 = vector.shape_cast %32 : vector<8xf32> to vector<8x1xf32>
    %34 = arith.mulf %22, %30 : vector<8x1xf32>
    %35 = arith.mulf %21, %33 : vector<8x1xf32>
    %36 = arith.subf %34, %35 : vector<8x1xf32>
    %cst_12 = arith.constant 1.000000e+01 : f32
    %37 = vector.broadcast %cst_12 : f32 to vector<8x1xf32>
    %38 = arith.mulf %36, %37 : vector<8x1xf32>
    %cst_13 = arith.constant 1.000000e+00 : f32
    %39 = vector.broadcast %cst_13 : f32 to vector<8x1xf32>
    %40 = arith.addf %14, %39 : vector<8x1xf32>
    %41 = math.log %40 : vector<8x1xf32>
    %42 = arith.subf %41, %10 : vector<8x1xf32>
    %43 = arith.mulf %42, %42 : vector<8x1xf32>
    %44 = arith.mulf %38, %12 : vector<8x1xf32>
    %cst_14 = arith.constant dense<0.000000e+00> : vector<1xf32>
    %45 = vector.multi_reduction <add>, %44, %cst_14 [0] : vector<8x1xf32> to vector<1xf32>
    %46 = vector.shape_cast %45 : vector<1xf32> to vector<1x1xf32>
    %47 = arith.mulf %43, %12 : vector<8x1xf32>
    %cst_15 = arith.constant dense<0.000000e+00> : vector<1xf32>
    %48 = vector.multi_reduction <add>, %47, %cst_15 [0] : vector<8x1xf32> to vector<1xf32>
    %49 = vector.shape_cast %48 : vector<1xf32> to vector<1x1xf32>
    %c0_16 = arith.constant 0 : index
    %c0_17 = arith.constant 0 : index
    %c0_18 = arith.constant 0 : index
    %50 = vector.load %arg6[%c0_16, %c0_17, %c0_18] : memref<1x1x1xf32, #tpu.memory_space<vmem>>, vector<1x1x1xf32>
    %51 = vector.shape_cast %46 : vector<1x1xf32> to vector<1x1x1xf32>
    %52 = arith.addf %50, %51 : vector<1x1x1xf32>
    %c0_19 = arith.constant 0 : index
    %c0_20 = arith.constant 0 : index
    %c0_21 = arith.constant 0 : index
    %53 = vector.load %arg6[%c0_19, %c0_20, %c0_21] : memref<1x1x1xf32, #tpu.memory_space<vmem>>, vector<1x1x1xf32>
    tpu.vector_store %arg6[%c0_19, %c0_20, %c0_21], %52 {strides = array<i32>} : memref<1x1x1xf32, #tpu.memory_space<vmem>>, vector<1x1x1xf32>,
    %c0_22 = arith.constant 0 : index
    %c0_23 = arith.constant 0 : index
    %c0_24 = arith.constant 0 : index
    %54 = vector.load %arg7[%c0_22, %c0_23, %c0_24] : memref<1x1x1xf32, #tpu.memory_space<vmem>>, vector<1x1x1xf32>
    %55 = vector.shape_cast %49 : vector<1x1xf32> to vector<1x1x1xf32>
    %56 = arith.addf %54, %55 : vector<1x1x1xf32>
    %c0_25 = arith.constant 0 : index
    %c0_26 = arith.constant 0 : index
    %c0_27 = arith.constant 0 : index
    %57 = vector.load %arg7[%c0_25, %c0_26, %c0_27] : memref<1x1x1xf32, #tpu.memory_space<vmem>>, vector<1x1x1xf32>
    tpu.vector_store %arg7[%c0_25, %c0_26, %c0_27], %56 {strides = array<i32>} : memref<1x1x1xf32, #tpu.memory_space<vmem>>, vector<1x1x1xf32>,
    return
  }
  func.func @transform_0(%arg0: i32, %arg1: i32) -> (i32, i32) {
    %c1_i32 = arith.constant 1 : i32
    %0 = arith.muli %arg0, %c1_i32 : i32
    %1 = arith.addi %0, %arg1 : i32
    %c0_i32 = arith.constant 0 : i32
    %c0_i32_0 = arith.constant 0 : i32
    return %1, %c0_i32 : i32, i32
  }
  func.func @transform_1(%arg0: i32, %arg1: i32) -> (i32, i32) {
    %c1_i32 = arith.constant 1 : i32
    %0 = arith.muli %arg0, %c1_i32 : i32
    %1 = arith.addi %0, %arg1 : i32
    %c0_i32 = arith.constant 0 : i32
    %c0_i32_0 = arith.constant 0 : i32
    return %1, %c0_i32 : i32, i32
  }
  func.func @transform_2(%arg0: i32, %arg1: i32) -> (i32, i32) {
    %c0_i32 = arith.constant 0 : i32
    %c0_i32_0 = arith.constant 0 : i32
    %c0_i32_1 = arith.constant 0 : i32
    return %c0_i32, %c0_i32_0 : i32, i32
  }
  func.func @transform_3(%arg0: i32, %arg1: i32) -> (i32, i32) {
    %c0_i32 = arith.constant 0 : i32
    %c0_i32_0 = arith.constant 0 : i32
    %c0_i32_1 = arith.constant 0 : i32
    return %c0_i32, %c0_i32_0 : i32, i32
  }
  func.func @transform_4(%arg0: i32, %arg1: i32) -> (i32, i32, i32) {
    %c0_i32 = arith.constant 0 : i32
    %c0_i32_0 = arith.constant 0 : i32
    %c0_i32_1 = arith.constant 0 : i32
    return %arg0, %c0_i32, %c0_i32_0 : i32, i32, i32
  }
  func.func @transform_5(%arg0: i32, %arg1: i32) -> (i32, i32, i32) {
    %c0_i32 = arith.constant 0 : i32
    %c0_i32_0 = arith.constant 0 : i32
    %c0_i32_1 = arith.constant 0 : i32
    return %arg0, %c0_i32, %c0_i32_0 : i32, i32, i32
  }
}

</mosaic_0001>

<bundles_post_ra>
// kernel: tpu_custom_call.1
= control target key start
LH: loop header
LB: loop body
LE: loop exit
PB: predicated region body
PF: predicated region fallthrough
CT: control target
= control target key end

     0   :  { %11 = vsyncpa [#allocation3], 0  ;;  %s301_s0 = inlined_call_operand.vmem [shape: f32[8,128], index: 0, kind: input, shape index: {}]   ;;  %s302_s1 = inlined_call_operand.vmem [shape: f32[8,128], index: 1, kind: input, shape index: {}]   ;;  %s303_s2 = inlined_call_operand.vmem [shape: f32[8,1], index: 2, kind: input, shape index: {}]   ;;  %s304_s3 = inlined_call_operand.vmem [shape: f32[8,1], index: 3, kind: input, shape index: {}]   ;;  %s305_s4 = inlined_call_operand.hbm [shape: f32[1,1,1], index: 4, kind: output, shape index: {0}]   ;;  %s306_s5 = inlined_call_operand.hbm [shape: f32[1,1,1], index: 5, kind: output, shape index: {1}]  }
   0x1   :  { %v63_v0 = vld [vmem:[%s302_s1] sm:$0xff] }
   0x2   :  { %12 = vsyncpa [#allocation5], 0  ;;  %90 = vmax.xlane.f32.xlu0 %v63_v0  ;;  %v62_v1 = vld [vmem:[%s301_s0] sm:$0xff]  ;;  %vm112_vm0 = vcmask 7168   ;;  %vm59_vm2 = vcmask 0   ;;  %v242_v21 = vmov 0.0  }
   0x3   :  { %v67_v11 = vld [vmem:[%s303_s2] sm:$0xff]  ;;  %60 = vst.msk [vmem:[#allocation2] sm:$0x1] %vm59_vm2, %v242_v21  ;;  %s243_s2 = smov [#allocation4]   ;;  %s153_s26 = sshll.u32 %s306_s5, 4  ;;  %s154_s26 = int_to_ptr.hbm [resolvable:$true] %s153_s26 }
   0x4   :  { %v69_v14 = vld [vmem:[%s304_s3] sm:$0xff]  ;;  %61 = vst.msk [vmem:[#allocation4] sm:$0x1] %vm59_vm2, %v242_v21  ;;  %s151_s3 = sshll.u32 %s243_s2, 4  ;;  %s244_s5 = smov [#allocation2]   ;;  %s152_s3 = int_to_ptr.vmem [resolvable:$true] %s151_s3 }
   0x5   :  { %s140_s27 = sshll.u32 %s244_s5, 4  ;;  %s142_s30 = sshll.u32 %s305_s4, 4  ;;  %s141_s27 = int_to_ptr.vmem [resolvable:$true] %s140_s27  ;;  %s143_s30 = int_to_ptr.hbm [resolvable:$true] %s142_s30 }
   0xa   :  { %70 = vadd.xlane.f32.xlu0 %v62_v1  ;;  %v128_v54 = vld [vmem:[#allocation2] sm:$0x1] }
   0xb   :  { %v132_v26 = vld [vmem:[#allocation4] sm:$0x1] }
  0x75   :  { %v91_v2 = vpop.xlane.xlu0 %90 }
  0x76   :  { %v92_v3 = vsub.f32 %v63_v0, %v91_v2 }
  0x78   :  { %v93_v4 = vmul.f32 1.442695, %v92_v3  ;;  %v99_v6 = vmul.f32 %v92_v3, %v62_v1 }
  0x7a   :  { %182 = vpow2.f32 %v93_v4 }
  0x7d   :  { %v71_v7 = vpop.xlane.xlu0 %70 }
  0x7e   :  { %v106_v8 = vadd.f32 1.0, %v71_v7  ;;  %vm72_vm1 = vcmp.gt.f32.partialorder %v71_v7, 0.0 }
  0x7f   :  { %v73_v19 = vsel %vm72_vm1, %v71_v7, 1.0 }
  0x80   :  { %v183_v5 = vpop.eup %182  ;;  %184 = vlog2.f32 %v106_v8  ;;  %vm79_vm3 = vweird.f32 %v73_v19  ;;  %v85_v31 = vand.u32 2147483648, %v73_v19  ;;  %v83_v33 = vand.u32 2147483647, %v73_v19 }
  0x81   :  { %95 = vadd.xlane.f32.xlu1 %v183_v5  ;;  %186 = vrcp.f32 %v73_v19 }
  0x82   :  { %v86_v34 = vor.u32 1.1754944e-38, %v85_v31  ;;  %vm84_vm6 = vcmp.eq.f32.partialorder %v83_v33, 8.507059e+37 }
  0x86   :  { %v185_v9 = vpop.eup %184 }
  0x87   :  { %v108_v10 = vmul.f32 0.6931472, %v185_v9  ;;  %v187_v25 = vpop.eup %186 }
  0x88   :  { %v75_v28 = vmul.f32 %v187_v25, %v73_v19  ;;  %vm80_vm4 = vweird.f32 %v187_v25 }
  0x89   :  { %100 = vadd.xlane.f32.xlu1 %v99_v6  ;;  %v109_v12 = vsub.f32 %v108_v10, %v67_v11  ;;  %vm81_vm5 = vmor %vm79_vm3, %vm80_vm4 }
  0x8a   :  { %v76_v29 = vsub.f32 1.0, %v75_v28 }
  0x8b   :  { %v110_v13 = vmul.f32 %v109_v12, %v109_v12 }
  0x8c   :  { %v77_v30 = vmul.f32 %v187_v25, %v76_v29 }
  0x8d   :  { %v120_v15 = vmul.f32 %v110_v13, %v69_v14 }
  0x8e   :  { %v78_v32 = vadd.f32 %v187_v25, %v77_v30 }
  0x8f   :  { %v121_v16 = vsel %vm112_vm0, %v120_v15, 0.0 }
  0x90   :  { %v122_v17 = vrot.slane %v121_v16, 4  ;;  %v82_v35 = vsel %vm81_vm5, %v187_v25, %v78_v32 }
  0x91   :  { %v87_v37 = vsel %vm84_vm6, %v86_v34, %v82_v35 }
  0x92   :  { %v123_v18 = vadd.f32 %v122_v17, %v121_v16  ;;  %v88_v38 = vsel %vm72_vm1, %v87_v37, 0.0 }
  0x93   :  { %v89_v41 = vmul.f32 %v88_v38, %v71_v7 }
  0x94   :  { %v124_v20 = vrot.slane %v123_v18, 2 }
  0x96   :  { %v125_v22 = vadd.f32 %v124_v20, %v123_v18 }
  0x98   :  { %v126_v23 = vrot.slane %v125_v22, 1 }
  0x9a   :  { %v127_v24 = vadd.f32 %v126_v23, %v125_v22 }
  0x9c   :  { %v133_v27 = vadd.f32 %v132_v26, %v127_v24 }
  0x9e   :  { %134 = vst.msk [vmem:[#allocation4] sm:$0x1] %vm59_vm2, %v133_v27 }
  0x9f   :  { %156 = dma.vmem_to_hbm [thread:$0]  %s152_s3, 16, %s154_s26, [#allocation5]  }
  0xf4   :  { %v96_v36 = vpop.xlane.xlu1 %95 }
  0xf5   :  { %188 = vlog2.f32 %v96_v36 }
  0xfb   :  { %v189_v39 = vpop.eup %188 }
  0xfc   :  { %v98_v40 = vmul.f32 0.6931472, %v189_v39  ;;  %v101_v42 = vpop.xlane.xlu1 %100 }
  0xfd   :  { %v103_v43 = vmul.f32 %v101_v42, %v88_v38 }
  0xfe   :  { %v102_v44 = vmul.f32 %v98_v40, %v89_v41 }
 0x100   :  { %v104_v45 = vsub.f32 %v102_v44, %v103_v43 }
 0x102   :  { %v105_v46 = vmul.f32 10.0, %v104_v45 }
 0x104   :  { %v111_v47 = vmul.f32 %v105_v46, %v69_v14 }
 0x106   :  { %v113_v48 = vsel %vm112_vm0, %v111_v47, 0.0 }
 0x107   :  { %v114_v49 = vrot.slane %v113_v48, 4 }
 0x109   :  { %v115_v50 = vadd.f32 %v114_v49, %v113_v48 }
 0x10b   :  { %v116_v51 = vrot.slane %v115_v50, 2 }
 0x10d   :  { %v117_v52 = vadd.f32 %v116_v51, %v115_v50 }
 0x10f   :  { %v118_v53 = vrot.slane %v117_v52, 1 }
 0x111   :  { %v119_v55 = vadd.f32 %v118_v53, %v117_v52 }
 0x113   :  { %v129_v56 = vadd.f32 %v128_v54, %v119_v55 }
 0x115   :  { %131 = vst.msk [vmem:[#allocation2] sm:$0x1] %vm59_vm2, %v129_v56 }
 0x116   :  { %145 = dma.vmem_to_hbm [thread:$0]  %s141_s27, 16, %s143_s30, [#allocation3]  }
 0x117   :  { %238 = dma.done.wait [#allocation3], 16  }
 0x118   :  { %239 = vsyncadd [#allocation3], 4294967280 }
 0x119   :  { %240 = dma.done.wait [#allocation5], 16  }
 0x11a   :  { %241 = vsyncadd [#allocation5], 4294967280 }
 0x11b   :  { %165 = vsyncpa [#allocation3], 1 }
 0x11c   :  { %166 = vsyncpa [#allocation5], 1 }

</bundles_post_ra>
